<compile_context>
chip_gen: v7x
topology: tpu7x:2x2x1
jax: 0.10.0
libtpu: 0.0.40
codegen_flags: <defaults>
</compile_context>

<pallas_src>
import math

import jax
import jax.numpy as jnp
from jax.experimental import pallas as pl
from jax.experimental.pallas import tpu as pltpu


# ----------------------------------------------------------------------------
# helpers
# ----------------------------------------------------------------------------
def _vmem_limit_bytes(resident_bytes):
    """Scoped-VMEM limit: resident footprint * 2 + headroom, floor 32 MiB,
    capped at 64 MiB so it stays within v7x physical VMEM."""
    return int(min(max(2 * resident_bytes + (4 << 20), 32 << 20), 64 << 20))


# ----------------------------------------------------------------------------
# Pallas kernels
# ----------------------------------------------------------------------------
def _fused_gcn_sabp_kernel(
        adj_ref, x_ref,
        w1_ref, b1_ref, w2_ref, b2_ref,
        wsab_ref, bsab_ref, wscore_t_ref, bscore_ref,
        wtop_t_ref, wbot_t_ref,
        nf2_ref, score_ref, ew_ref, xw_ref):
    """Fused: GCN1+ReLU -> GCN2+ReLU -> SABP embed-GCN / score-GCN / MI projs.

    adj_ref : [N, N] bf16 symmetrically-normalized adjacency (with self loops)
    x_ref   : [N, 112] bf16 input node features
    *_t refs: width-1 weight vectors pre-transposed to (1, C), kept f32 so the
              projections run on the VPU (broadcast-mul + lane reduce).
    MXU matmuls take bf16 operands with f32 accumulation; elementwise math f32.
    """
    f32, bf16 = jnp.float32, jnp.bfloat16
    adj = adj_ref[...]                                     # bf16
    x = x_ref[...]                                         # bf16

    # ---- GCNConv(112, 64) + ReLU  (A @ (X W1) + b1) --------------------------
    xw1 = jnp.dot(x, w1_ref[...], preferred_element_type=f32)
    nf1 = jnp.dot(adj, xw1.astype(bf16), preferred_element_type=f32) + b1_ref[...]
    nf1 = jnp.maximum(nf1, 0.0)

    # ---- GCNConv(64, 20) + ReLU ----------------------------------------------
    xw2 = jnp.dot(nf1.astype(bf16), w2_ref[...], preferred_element_type=f32)
    nf2 = jnp.dot(adj, xw2.astype(bf16), preferred_element_type=f32) + b2_ref[...]
    nf2 = jnp.maximum(nf2, 0.0)

    # ---- shared aggregation for the two SABP GCN heads ------------------------
    # A @ (X W) == (A @ X) W, so A @ nf2 is computed once and reused.
    agg2 = jnp.dot(adj, nf2.astype(bf16), preferred_element_type=f32)

    # SABP.gcn : GCNConv(20, 20), no nonlinearity
    embed = jnp.dot(agg2.astype(bf16), wsab_ref[...],
                    preferred_element_type=f32) + bsab_ref[...]

    # Width-1 projections -> VPU broadcast-mul + lane reduce (kept off the MXU).
    # score : SABP.score_layer GCNConv(20, 1)
    score = jnp.sum(agg2 * wscore_t_ref[...], axis=1, keepdims=True) + bscore_ref[...]
    # ew = embed @ w_top ; xw = nf2 @ w_bot  (MI head halves, bias added in JAX)
    ew = jnp.sum(embed * wtop_t_ref[...], axis=1, keepdims=True)
    xw = jnp.sum(nf2 * wbot_t_ref[...], axis=1, keepdims=True)

    nf2_ref[...] = nf2.astype(nf2_ref.dtype)
    score_ref[...] = score.astype(score_ref.dtype)
    ew_ref[...] = ew.astype(ew_ref.dtype)
    xw_ref[...] = xw.astype(xw_ref.dtype)


def fused_gcn_sabp(adj_norm, x, params):
    n = x.shape[0]
    c = params["w2"].shape[1]                               # 20
    f32, bf16 = jnp.float32, jnp.bfloat16

    w_fc = params["fc_w"].astype(f32)                       # (2C, 1)
    w_top_t = w_fc[:c].T                                    # (1, C)
    w_bot_t = w_fc[c:].T                                    # (1, C)
    w_score_t = params["w_score"].astype(f32).T             # (1, C)

    args = (
        adj_norm.astype(bf16), x.astype(bf16),
        params["w1"].astype(bf16), params["b1"].reshape(1, -1).astype(f32),
        params["w2"].astype(bf16), params["b2"].reshape(1, -1).astype(f32),
        params["w_sab_gcn"].astype(bf16),
        params["b_sab_gcn"].reshape(1, -1).astype(f32),
        w_score_t, params["b_score"].reshape(1, 1).astype(f32),
        w_top_t, w_bot_t,
    )
    out_shape = (
        jax.ShapeDtypeStruct((n, c), f32),   # nf2
        jax.ShapeDtypeStruct((n, 1), f32),   # score
        jax.ShapeDtypeStruct((n, 1), f32),   # embed @ w_top
        jax.ShapeDtypeStruct((n, 1), f32),   # nf2   @ w_bot
    )
    in_bytes = sum(int(a.size) * a.dtype.itemsize for a in args)
    out_bytes = n * (c + 3) * 4
    flops = 2 * n * (112 * 64 + n * 64 + 64 * 20 + n * 20 + n * 20 + 20 * 20)

    # Gridless call: full-array VMEM blocks, single launch, adjacency DMA'd once.
    return pl.pallas_call(
        _fused_gcn_sabp_kernel,
        out_shape=out_shape,
        compiler_params=pltpu.CompilerParams(
            vmem_limit_bytes=_vmem_limit_bytes(in_bytes + out_bytes)),
        cost_estimate=pl.CostEstimate(
            flops=flops, transcendentals=0,
            bytes_accessed=in_bytes + out_bytes),
    )(*args)


def _pooled_gcn_kernel(adj_ref, nf2p_ref, scorep_ref, w3_ref, b3_ref, o_ref):
    """Pooled-graph stage, fully fused:
         A_hat = A_pool + I ; d = rsqrt(rowsum(A_hat))
         x_pool = nf2[perm] * tanh(score[perm])
         out    = x_pool + relu(d * (A_hat @ (d * (x_pool @ W3))) + b3)
       (D^-1/2 A_hat D^-1/2 applied associatively -> no column-scaled NxN matrix,
        no transpose; rowsum on XLU, rsqrt/tanh on EUP, matmuls bf16 on MXU.)"""
    f32, bf16 = jnp.float32, jnp.bfloat16
    k = adj_ref.shape[0]
    adj_raw = adj_ref[...]                                         # f32, no self loops

    rows = jax.lax.broadcasted_iota(jnp.int32, (k, k), 0)
    cols = jax.lax.broadcasted_iota(jnp.int32, (k, k), 1)
    a_hat = adj_raw + jnp.where(rows == cols, 1.0, 0.0)            # A + I, f32

    deg = jnp.sum(a_hat, axis=1, keepdims=True)                    # (k, 1)
    d_inv_sqrt = jnp.where(deg > 0, jax.lax.rsqrt(deg), 0.0)       # (k, 1)

    x_pool = nf2p_ref[...] * jnp.tanh(scorep_ref[...])             # (k, C)

    xw3 = jnp.dot(x_pool.astype(bf16), w3_ref[...], preferred_element_type=f32)
    agg = jnp.dot(a_hat.astype(bf16), (d_inv_sqrt * xw3).astype(bf16),
                  preferred_element_type=f32)
    nf3 = jnp.maximum(d_inv_sqrt * agg + b3_ref[...], 0.0)

    o_ref[...] = (x_pool + nf3).astype(o_ref.dtype)


def pooled_gcn(adj_pool_raw, nf2_perm, score_perm, w3, b3):
    k, c = nf2_perm.shape
    f32, bf16 = jnp.float32, jnp.bfloat16
    args = (adj_pool_raw.astype(f32), nf2_perm.astype(f32),
            score_perm.astype(f32), w3.astype(bf16),
            b3.reshape(1, -1).astype(f32))
    in_bytes = sum(int(a.size) * a.dtype.itemsize for a in args)
    out_bytes = k * c * 4
    flops = 2 * k * (c * c + k * c) + 2 * k * k
    return pl.pallas_call(
        _pooled_gcn_kernel,
        out_shape=jax.ShapeDtypeStruct((k, c), f32),
        compiler_params=pltpu.CompilerParams(
            vmem_limit_bytes=_vmem_limit_bytes(in_bytes + out_bytes)),
        cost_estimate=pl.CostEstimate(
            flops=flops, transcendentals=2 * k,
            bytes_accessed=in_bytes + out_bytes),
    )(*args)


# ----------------------------------------------------------------------------
# JAX glue (adjacency build, normalization, top-k pooling, MI tail)
# ----------------------------------------------------------------------------
def dense_weighted_adj(edge_index, edge_attr, num_nodes):
    """A[dst, src] = edge weight (messages flow src -> dst), no self loops."""
    src = edge_index[0]
    dst = edge_index[1]
    adj = jnp.zeros((num_nodes, num_nodes), jnp.float32)
    adj = adj.at[dst, src].add(edge_attr.astype(jnp.float32))
    return adj


def gcn_normalize(adj_raw):
    """A_hat = A + I ; D^{-1/2} A_hat D^{-1/2}."""
    n = adj_raw.shape[0]
    a_hat = adj_raw + jnp.eye(n, dtype=jnp.float32)
    deg = jnp.sum(a_hat, axis=1)
    d_inv_sqrt = jnp.where(deg > 0, 1.0 / jnp.sqrt(deg), 0.0)
    return a_hat * d_inv_sqrt[:, None] * d_inv_sqrt[None, :]


def glorot(key, shape):
    fan_in, fan_out = shape[0], shape[1]
    lim = math.sqrt(6.0 / (fan_in + fan_out))
    return jax.random.uniform(key, shape, jnp.float32, -lim, lim)


def init_params(key):
    ks = jax.random.split(key, 12)
    return {
        "w1": glorot(ks[0], (112, 64)), "b1": jnp.zeros((64,), jnp.float32),
        "w2": glorot(ks[1], (64, 20)),  "b2": jnp.zeros((20,), jnp.float32),
        # SABP(20, ratio=0.9)
        "w_score": glorot(ks[2], (20, 1)), "b_score": jnp.zeros((1,), jnp.float32),
        "w_sab_gcn": glorot(ks[3], (20, 20)), "b_sab_gcn": jnp.zeros((20,), jnp.float32),
        "fc_w": glorot(ks[4], (40, 1)),
        "fc_b": jax.random.uniform(ks[5], (1,), jnp.float32, -0.1, 0.1),
        "w3": glorot(ks[6], (20, 20)), "b3": jnp.zeros((20,), jnp.float32),
    }


@jax.jit
def local_gnn_forward(params, features, edge_index, edge_attr, perm_key):
    n = features.shape[0]
    adj_raw = dense_weighted_adj(edge_index, edge_attr, n)
    adj_norm = gcn_normalize(adj_raw)

    # One fused Pallas kernel: GCN1+ReLU, GCN2+ReLU, SABP embed/score GCNs and
    # the width-1 MI projections (ew = embed@w_top, xw = nf2@w_bot).
    nf2, score_col, ew, xw = fused_gcn_sabp(adj_norm, features, params)
    score = score_col[:, 0]

    # SABP mutual-information tail — O(N) in plain JAX.  The torch.randperm row
    # shuffle collapses to a gather of xw (no NxN permutation matmul needed).
    rand_perm = jax.random.permutation(perm_key, n)
    b_fc = params["fc_b"].reshape(1, 1)
    joint = ew + xw + b_fc
    margin = ew + xw[rand_perm] + b_fc
    eps = 1e-12
    joint_n = joint / jnp.maximum(jnp.abs(joint), eps)       # F.normalize(dim=1), width 1
    margin_n = margin / jnp.maximum(jnp.abs(margin), eps)
    mi = jnp.mean(joint_n) - jnp.log(jnp.mean(jnp.exp(margin_n)))

    # top-k pooling (single graph => batch all zeros)
    k = int(math.ceil(0.9 * n))
    perm = jnp.argsort(-score)[:k]                           # top-k node indices
    nf2_perm = nf2[perm]
    score_perm = score_col[perm]                             # (k, 1)

    # filter_adj equivalent: restrict the dense weighted adjacency to kept
    # nodes; self loops / normalization are re-applied inside the pooled kernel.
    adj_pool_raw = adj_raw[perm][:, perm]

    # GCNConv(20, 20)+ReLU on the pooled graph, fused with normalization, tanh
    # score gating and residual add — second Pallas kernel.
    cat_feature = pooled_gcn(adj_pool_raw, nf2_perm, score_perm,
                             params["w3"], params["b3"])
    graph_embedding = cat_feature.reshape(1, -1)
    return graph_embedding, perm, mi


# ----------------------------------------------------------------------------
if __name__ == "__main__":
    key = jax.random.PRNGKey(0)
    k_param, k_x, k_src, k_dst, k_attr, k_perm = jax.random.split(key, 6)

    N, E = 16, 40
    params = init_params(k_param)
    features = jax.random.normal(k_x, (N, 112), jnp.float32)
    src = jax.random.randint(k_src, (E,), 0, N, jnp.int32)
    dst = jax.random.randint(k_dst, (E,), 0, N, jnp.int32)
    edge_index = jnp.stack([src, dst], axis=0)                       # [2, E]
    edge_attr = jax.random.uniform(k_attr, (E,), jnp.float32, 0.1, 1.0)

    graph_embedding, perm, mi = local_gnn_forward(
        params, features, edge_index, edge_attr, k_perm)

    jax.block_until_ready((graph_embedding, perm, mi))
    assert graph_embedding.shape == (1, int(math.ceil(0.9 * N)) * 20)
    assert jnp.isfinite(graph_embedding).all() and jnp.isfinite(mi)
    print("KERNEL_OK")
</pallas_src>

<mosaic_0001>
module attributes {stable_mosaic.version = 11 : i64} {
  func.func @_fused_gcn_sabp_kernel(%arg0: memref<16x16xbf16, #tpu.memory_space<vmem>>, %arg1: memref<16x112xbf16, #tpu.memory_space<vmem>>, %arg2: memref<112x64xbf16, #tpu.memory_space<vmem>>, %arg3: memref<1x64xf32, #tpu.memory_space<vmem>>, %arg4: memref<64x20xbf16, #tpu.memory_space<vmem>>, %arg5: memref<1x20xf32, #tpu.memory_space<vmem>>, %arg6: memref<20x20xbf16, #tpu.memory_space<vmem>>, %arg7: memref<1x20xf32, #tpu.memory_space<vmem>>, %arg8: memref<1x20xf32, #tpu.memory_space<vmem>>, %arg9: memref<1x1xf32, #tpu.memory_space<vmem>>, %arg10: memref<1x20xf32, #tpu.memory_space<vmem>>, %arg11: memref<1x20xf32, #tpu.memory_space<vmem>>, %arg12: memref<16x20xf32, #tpu.memory_space<vmem>>, %arg13: memref<16x1xf32, #tpu.memory_space<vmem>>, %arg14: memref<16x1xf32, #tpu.memory_space<vmem>>, %arg15: memref<16x1xf32, #tpu.memory_space<vmem>>) attributes {dimension_semantics = [], scalar_prefetch = 0 : i64, scratch_operands = 0 : i64, tpu.core_type = #tpu.core_type<tc>} {
    %c0 = arith.constant 0 : index
    %c0_0 = arith.constant 0 : index
    %0 = vector.load %arg0[%c0, %c0_0] : memref<16x16xbf16, #tpu.memory_space<vmem>>, vector<16x16xbf16>
    %c0_1 = arith.constant 0 : index
    %c0_2 = arith.constant 0 : index
    %1 = vector.load %arg1[%c0_1, %c0_2] : memref<16x112xbf16, #tpu.memory_space<vmem>>, vector<16x112xbf16>
    %c0_3 = arith.constant 0 : index
    %c0_4 = arith.constant 0 : index
    %2 = vector.load %arg2[%c0_3, %c0_4] : memref<112x64xbf16, #tpu.memory_space<vmem>>, vector<112x64xbf16>
    %cst = arith.constant dense<0.000000e+00> : vector<16x64xf32>
    %3 = tpu.matmul %1, %2, %cst {dimension_numbers = #tpu.dot_dimension_numbers<[1], [0], [0], [1], [0, 0, 1, 1], [], []>} : vector<16x112xbf16>, vector<112x64xbf16>, vector<16x64xf32> -> vector<16x64xf32>
    %4 = arith.truncf %3 : vector<16x64xf32> to vector<16x64xbf16>
    %cst_5 = arith.constant dense<0.000000e+00> : vector<16x64xf32>
    %5 = tpu.matmul %0, %4, %cst_5 {dimension_numbers = #tpu.dot_dimension_numbers<[1], [0], [0], [1], [0, 0, 1, 1], [], []>} : vector<16x16xbf16>, vector<16x64xbf16>, vector<16x64xf32> -> vector<16x64xf32>
    %c0_6 = arith.constant 0 : index
    %c0_7 = arith.constant 0 : index
    %6 = vector.load %arg3[%c0_6, %c0_7] : memref<1x64xf32, #tpu.memory_space<vmem>>, vector<1x64xf32>
    %7 = vector.broadcast %6 : vector<1x64xf32> to vector<16x64xf32>
    %8 = arith.addf %5, %7 : vector<16x64xf32>
    %cst_8 = arith.constant 0.000000e+00 : f32
    %9 = vector.broadcast %cst_8 : f32 to vector<16x64xf32>
    %10 = arith.maximumf %8, %9 : vector<16x64xf32>
    %11 = arith.truncf %10 : vector<16x64xf32> to vector<16x64xbf16>
    %c0_9 = arith.constant 0 : index
    %c0_10 = arith.constant 0 : index
    %12 = vector.load %arg4[%c0_9, %c0_10] : memref<64x20xbf16, #tpu.memory_space<vmem>>, vector<64x20xbf16>
    %cst_11 = arith.constant dense<0.000000e+00> : vector<16x20xf32>
    %13 = tpu.matmul %11, %12, %cst_11 {dimension_numbers = #tpu.dot_dimension_numbers<[1], [0], [0], [1], [0, 0, 1, 1], [], []>} : vector<16x64xbf16>, vector<64x20xbf16>, vector<16x20xf32> -> vector<16x20xf32>
    %14 = arith.truncf %13 : vector<16x20xf32> to vector<16x20xbf16>
    %cst_12 = arith.constant dense<0.000000e+00> : vector<16x20xf32>
    %15 = tpu.matmul %0, %14, %cst_12 {dimension_numbers = #tpu.dot_dimension_numbers<[1], [0], [0], [1], [0, 0, 1, 1], [], []>} : vector<16x16xbf16>, vector<16x20xbf16>, vector<16x20xf32> -> vector<16x20xf32>
    %c0_13 = arith.constant 0 : index
    %c0_14 = arith.constant 0 : index
    %16 = vector.load %arg5[%c0_13, %c0_14] : memref<1x20xf32, #tpu.memory_space<vmem>>, vector<1x20xf32>
    %17 = vector.broadcast %16 : vector<1x20xf32> to vector<16x20xf32>
    %18 = arith.addf %15, %17 : vector<16x20xf32>
    %cst_15 = arith.constant 0.000000e+00 : f32
    %19 = vector.broadcast %cst_15 : f32 to vector<16x20xf32>
    %20 = arith.maximumf %18, %19 : vector<16x20xf32>
    %21 = arith.truncf %20 : vector<16x20xf32> to vector<16x20xbf16>
    %cst_16 = arith.constant dense<0.000000e+00> : vector<16x20xf32>
    %22 = tpu.matmul %0, %21, %cst_16 {dimension_numbers = #tpu.dot_dimension_numbers<[1], [0], [0], [1], [0, 0, 1, 1], [], []>} : vector<16x16xbf16>, vector<16x20xbf16>, vector<16x20xf32> -> vector<16x20xf32>
    %23 = arith.truncf %22 : vector<16x20xf32> to vector<16x20xbf16>
    %c0_17 = arith.constant 0 : index
    %c0_18 = arith.constant 0 : index
    %24 = vector.load %arg6[%c0_17, %c0_18] : memref<20x20xbf16, #tpu.memory_space<vmem>>, vector<20x20xbf16>
    %cst_19 = arith.constant dense<0.000000e+00> : vector<16x20xf32>
    %25 = tpu.matmul %23, %24, %cst_19 {dimension_numbers = #tpu.dot_dimension_numbers<[1], [0], [0], [1], [0, 0, 1, 1], [], []>} : vector<16x20xbf16>, vector<20x20xbf16>, vector<16x20xf32> -> vector<16x20xf32>
    %c0_20 = arith.constant 0 : index
    %c0_21 = arith.constant 0 : index
    %26 = vector.load %arg7[%c0_20, %c0_21] : memref<1x20xf32, #tpu.memory_space<vmem>>, vector<1x20xf32>
    %27 = vector.broadcast %26 : vector<1x20xf32> to vector<16x20xf32>
    %28 = arith.addf %25, %27 : vector<16x20xf32>
    %c0_22 = arith.constant 0 : index
    %c0_23 = arith.constant 0 : index
    %29 = vector.load %arg8[%c0_22, %c0_23] : memref<1x20xf32, #tpu.memory_space<vmem>>, vector<1x20xf32>
    %30 = vector.broadcast %29 : vector<1x20xf32> to vector<16x20xf32>
    %31 = arith.mulf %22, %30 : vector<16x20xf32>
    %cst_24 = arith.constant dense<0.000000e+00> : vector<16xf32>
    %32 = vector.multi_reduction <add>, %31, %cst_24 [1] : vector<16x20xf32> to vector<16xf32>
    %33 = vector.shape_cast %32 : vector<16xf32> to vector<16x1xf32>
    %c0_25 = arith.constant 0 : index
    %c0_26 = arith.constant 0 : index
    %34 = vector.load %arg9[%c0_25, %c0_26] : memref<1x1xf32, #tpu.memory_space<vmem>>, vector<1x1xf32>
    %35 = vector.broadcast %34 : vector<1x1xf32> to vector<16x1xf32>
    %36 = arith.addf %33, %35 : vector<16x1xf32>
    %c0_27 = arith.constant 0 : index
    %c0_28 = arith.constant 0 : index
    %37 = vector.load %arg10[%c0_27, %c0_28] : memref<1x20xf32, #tpu.memory_space<vmem>>, vector<1x20xf32>
    %38 = vector.broadcast %37 : vector<1x20xf32> to vector<16x20xf32>
    %39 = arith.mulf %28, %38 : vector<16x20xf32>
    %cst_29 = arith.constant dense<0.000000e+00> : vector<16xf32>
    %40 = vector.multi_reduction <add>, %39, %cst_29 [1] : vector<16x20xf32> to vector<16xf32>
    %41 = vector.shape_cast %40 : vector<16xf32> to vector<16x1xf32>
    %c0_30 = arith.constant 0 : index
    %c0_31 = arith.constant 0 : index
    %42 = vector.load %arg11[%c0_30, %c0_31] : memref<1x20xf32, #tpu.memory_space<vmem>>, vector<1x20xf32>
    %43 = vector.broadcast %42 : vector<1x20xf32> to vector<16x20xf32>
    %44 = arith.mulf %20, %43 : vector<16x20xf32>
    %cst_32 = arith.constant dense<0.000000e+00> : vector<16xf32>
    %45 = vector.multi_reduction <add>, %44, %cst_32 [1] : vector<16x20xf32> to vector<16xf32>
    %46 = vector.shape_cast %45 : vector<16xf32> to vector<16x1xf32>
    %c0_33 = arith.constant 0 : index
    %c0_34 = arith.constant 0 : index
    %47 = vector.load %arg12[%c0_33, %c0_34] : memref<16x20xf32, #tpu.memory_space<vmem>>, vector<16x20xf32>
    tpu.vector_store %arg12[%c0_33, %c0_34], %20 {strides = array<i32>} : memref<16x20xf32, #tpu.memory_space<vmem>>, vector<16x20xf32>,
    %c0_35 = arith.constant 0 : index
    %c0_36 = arith.constant 0 : index
    %48 = vector.load %arg13[%c0_35, %c0_36] : memref<16x1xf32, #tpu.memory_space<vmem>>, vector<16x1xf32>
    tpu.vector_store %arg13[%c0_35, %c0_36], %36 {strides = array<i32>} : memref<16x1xf32, #tpu.memory_space<vmem>>, vector<16x1xf32>,
    %c0_37 = arith.constant 0 : index
    %c0_38 = arith.constant 0 : index
    %49 = vector.load %arg14[%c0_37, %c0_38] : memref<16x1xf32, #tpu.memory_space<vmem>>, vector<16x1xf32>
    tpu.vector_store %arg14[%c0_37, %c0_38], %41 {strides = array<i32>} : memref<16x1xf32, #tpu.memory_space<vmem>>, vector<16x1xf32>,
    %c0_39 = arith.constant 0 : index
    %c0_40 = arith.constant 0 : index
    %50 = vector.load %arg15[%c0_39, %c0_40] : memref<16x1xf32, #tpu.memory_space<vmem>>, vector<16x1xf32>
    tpu.vector_store %arg15[%c0_39, %c0_40], %46 {strides = array<i32>} : memref<16x1xf32, #tpu.memory_space<vmem>>, vector<16x1xf32>,
    return
  }
}

module attributes {stable_mosaic.version = 11 : i64} {
  func.func @_pooled_gcn_kernel(%arg0: memref<15x15xf32, #tpu.memory_space<vmem>>, %arg1: memref<15x20xf32, #tpu.memory_space<vmem>>, %arg2: memref<15x1xf32, #tpu.memory_space<vmem>>, %arg3: memref<20x20xbf16, #tpu.memory_space<vmem>>, %arg4: memref<1x20xf32, #tpu.memory_space<vmem>>, %arg5: memref<15x20xf32, #tpu.memory_space<vmem>>) attributes {dimension_semantics = [], scalar_prefetch = 0 : i64, scratch_operands = 0 : i64, tpu.core_type = #tpu.core_type<tc>} {
    %c0 = arith.constant 0 : index
    %c0_0 = arith.constant 0 : index
    %0 = vector.load %arg0[%c0, %c0_0] : memref<15x15xf32, #tpu.memory_space<vmem>>, vector<15x15xf32>
    %1 = tpu.iota {dimensions = array<i32: 0>} : vector<15x15xi32>
    %2 = tpu.iota {dimensions = array<i32: 1>} : vector<15x15xi32>
    %3 = arith.cmpi eq, %1, %2 : vector<15x15xi32>
    %cst = arith.constant 1.000000e+00 : f32
    %cst_1 = arith.constant 0.000000e+00 : f32
    %4 = vector.broadcast %cst : f32 to vector<15x15xf32>
    %5 = vector.broadcast %cst_1 : f32 to vector<15x15xf32>
    %6 = arith.select %3, %4, %5 : vector<15x15xi1>, vector<15x15xf32>
    %7 = arith.addf %0, %6 : vector<15x15xf32>
    %cst_2 = arith.constant dense<0.000000e+00> : vector<15xf32>
    %8 = vector.multi_reduction <add>, %7, %cst_2 [1] : vector<15x15xf32> to vector<15xf32>
    %9 = vector.shape_cast %8 : vector<15xf32> to vector<15x1xf32>
    %cst_3 = arith.constant 0.000000e+00 : f32
    %10 = vector.broadcast %cst_3 : f32 to vector<15x1xf32>
    %11 = arith.cmpf ogt, %9, %10 : vector<15x1xf32>
    %12 = math.rsqrt %9 : vector<15x1xf32>
    %cst_4 = arith.constant 0.000000e+00 : f32
    %13 = vector.broadcast %cst_4 : f32 to vector<15x1xf32>
    %14 = arith.select %11, %12, %13 : vector<15x1xi1>, vector<15x1xf32>
    %c0_5 = arith.constant 0 : index
    %c0_6 = arith.constant 0 : index
    %15 = vector.load %arg1[%c0_5, %c0_6] : memref<15x20xf32, #tpu.memory_space<vmem>>, vector<15x20xf32>
    %c0_7 = arith.constant 0 : index
    %c0_8 = arith.constant 0 : index
    %16 = vector.load %arg2[%c0_7, %c0_8] : memref<15x1xf32, #tpu.memory_space<vmem>>, vector<15x1xf32>
    %17 = math.tanh %16 : vector<15x1xf32>
    %18 = vector.broadcast %17 : vector<15x1xf32> to vector<15x20xf32>
    %19 = arith.mulf %15, %18 : vector<15x20xf32>
    %20 = arith.truncf %19 : vector<15x20xf32> to vector<15x20xbf16>
    %c0_9 = arith.constant 0 : index
    %c0_10 = arith.constant 0 : index
    %21 = vector.load %arg3[%c0_9, %c0_10] : memref<20x20xbf16, #tpu.memory_space<vmem>>, vector<20x20xbf16>
    %cst_11 = arith.constant dense<0.000000e+00> : vector<15x20xf32>
    %22 = tpu.matmul %20, %21, %cst_11 {dimension_numbers = #tpu.dot_dimension_numbers<[1], [0], [0], [1], [0, 0, 1, 1], [], []>} : vector<15x20xbf16>, vector<20x20xbf16>, vector<15x20xf32> -> vector<15x20xf32>
    %23 = arith.truncf %7 : vector<15x15xf32> to vector<15x15xbf16>
    %24 = vector.broadcast %14 : vector<15x1xf32> to vector<15x20xf32>
    %25 = arith.mulf %24, %22 : vector<15x20xf32>
    %26 = arith.truncf %25 : vector<15x20xf32> to vector<15x20xbf16>
    %cst_12 = arith.constant dense<0.000000e+00> : vector<15x20xf32>
    %27 = tpu.matmul %23, %26, %cst_12 {dimension_numbers = #tpu.dot_dimension_numbers<[1], [0], [0], [1], [0, 0, 1, 1], [], []>} : vector<15x15xbf16>, vector<15x20xbf16>, vector<15x20xf32> -> vector<15x20xf32>
    %28 = vector.broadcast %14 : vector<15x1xf32> to vector<15x20xf32>
    %29 = arith.mulf %28, %27 : vector<15x20xf32>
    %c0_13 = arith.constant 0 : index
    %c0_14 = arith.constant 0 : index
    %30 = vector.load %arg4[%c0_13, %c0_14] : memref<1x20xf32, #tpu.memory_space<vmem>>, vector<1x20xf32>
    %31 = vector.broadcast %30 : vector<1x20xf32> to vector<15x20xf32>
    %32 = arith.addf %29, %31 : vector<15x20xf32>
    %cst_15 = arith.constant 0.000000e+00 : f32
    %33 = vector.broadcast %cst_15 : f32 to vector<15x20xf32>
    %34 = arith.maximumf %32, %33 : vector<15x20xf32>
    %35 = arith.addf %19, %34 : vector<15x20xf32>
    %c0_16 = arith.constant 0 : index
    %c0_17 = arith.constant 0 : index
    %36 = vector.load %arg5[%c0_16, %c0_17] : memref<15x20xf32, #tpu.memory_space<vmem>>, vector<15x20xf32>
    tpu.vector_store %arg5[%c0_16, %c0_17], %35 {strides = array<i32>} : memref<15x20xf32, #tpu.memory_space<vmem>>, vector<15x20xf32>,
    return
  }
}

</mosaic_0001>

<bundles_post_ra>
// kernel: local_gnn_forward.2
= control target key start
LH: loop header
LB: loop body
LE: loop exit
PB: predicated region body
PF: predicated region fallthrough
CT: control target
= control target key end

     0   :  { %v660_v0 = vmov 0.0   ;;  %vm661_vm0 = vmmov 0   ;;  %vm113_vm1 = vcmask 916480   ;;  %vm171_vm2 = vcmask 130048   ;;  %s883_s2 = inlined_call_operand.vmem [shape: bf16[112,64], index: 2, kind: input, shape index: {}]   ;;  %s884_s1 = inlined_call_operand.vmem [shape: bf16[16,112], index: 1, kind: input, shape index: {}]   ;;  %s885_s0 = inlined_call_operand.vmem [shape: bf16[16,16], index: 0, kind: input, shape index: {}]   ;;  %s886_s4 = inlined_call_operand.vmem [shape: bf16[64,20], index: 4, kind: input, shape index: {}]   ;;  %s887_s3 = inlined_call_operand.vmem [shape: f32[1,64], index: 3, kind: input, shape index: {}]   ;;  %s888_s6 = inlined_call_operand.vmem [shape: bf16[20,20], index: 6, kind: input, shape index: {}]   ;;  %s889_s5 = inlined_call_operand.vmem [shape: f32[1,20], index: 5, kind: input, shape index: {}]   ;;  %s890_s12 = inlined_call_operand.vmem [shape: f32[16,20], index: 12, kind: output, shape index: {0}]   ;;  %s891_s11 = inlined_call_operand.vmem [shape: f32[1,20], index: 11, kind: input, shape index: {}]   ;;  %s892_s9 = inlined_call_operand.<no memory space> [shape: f32[1,1], index: 9, kind: input, shape index: {}]   ;;  %s893_s8 = inlined_call_operand.vmem [shape: f32[1,20], index: 8, kind: input, shape index: {}]   ;;  %s894_s13 = inlined_call_operand.vmem [shape: f32[16,1], index: 13, kind: output, shape index: {1}]   ;;  %s895_s15 = inlined_call_operand.vmem [shape: f32[16,1], index: 15, kind: output, shape index: {3}]   ;;  %s896_s7 = inlined_call_operand.vmem [shape: f32[1,20], index: 7, kind: input, shape index: {}]   ;;  %s897_s10 = inlined_call_operand.vmem [shape: f32[1,20], index: 10, kind: input, shape index: {}]   ;;  %s898_s14 = inlined_call_operand.vmem [shape: f32[16,1], index: 14, kind: output, shape index: {2}]  }
   0x1   :  { %587 = vmatprep.subr.bf16.mxu0 %v660_v0  ;;  %v645_v1 = vld [vmem:[%s883_s2] sm:$0xff]   ;;  %601 = vmatprep.mubr.msk.bf16.mxu0 %vm661_vm0, %v660_v0  ;;  %v646_v2 = vld [vmem:[%s883_s2 + $0x8] sm:$0xff]   ;;  %v647_v3 = vld [vmem:[%s883_s2 + $0x10] sm:$0xff]   ;;  %vm251_vm3 = vcmask 523264   ;;  %vm409_vm4 = vcmask 162816   ;;  %vm413_vm5 = vcmask 1041408   ;;  %v21_v49 = vstv %s892_s9 }
   0x2   :  { %605 = vmatprep.subr.bf16.mxu1 %v660_v0  ;;  %607 = vmatprep.mubr.msk.bf16.mxu1 %vm661_vm0, %v660_v0  ;;  %v648_v4 = vld [vmem:[%s883_s2 + $0x18] sm:$0xff]   ;;  %v649_v5 = vld [vmem:[%s883_s2 + $0x20] sm:$0xff]   ;;  %v650_v6 = vld [vmem:[%s883_s2 + $0x28] sm:$0xff]   ;;  %22 = vst [vmem:[#allocation2] sm:$0x1] %v21_v49  ;;  %vm514_vm6 = vcmask 7168  }
   0x3   :  { %588 = vmatpush3.bf16.msra.mxu0 %v645_v1  ;;  %v651_v7 = vld [vmem:[%s883_s2 + $0x30] sm:$0xff]   ;;  %v652_v8 = vld [vmem:[%s884_s1] sm:$0xff]   ;;  %v655_v16 = vld [vmem:[%s886_s4 + $0x8] sm:$0xff]  }
   0x4   :  { %589 = vmatprep.subr.bf16.mxu0 %v660_v0  ;;  %v784_v14 = vld [vmem:[%s885_s0] sm:$0xff]   ;;  %v656_v17 = vld [vmem:[%s886_s4 + $0x10] sm:$0xff]   ;;  %v657_v18 = vld [vmem:[%s886_s4 + $0x18] sm:$0xff]  }
   0x5   :  { %v654_v15 = vld [vmem:[%s886_s4] sm:$0xff]   ;;  %v659_v47 = vld [vmem:[%s888_s6 + $0x8] ss:$0 sps:$4 sm:$0x33]  }
   0x6   :  { %v546_v19 = vld [vmem:[%s887_s3] ss:$0 sm:$0xff]  ;;  %v415_v48 = vsel %vm413_vm5, %v659_v47, 0 }
   0x7   :  { %590 = vmatpush3.bf16.msra.mxu0 %v646_v2  ;;  %v658_v34 = vld [vmem:[%s888_s6] sm:$0xff]  }
   0x8   :  { %591 = vmatprep.subr.bf16.mxu0 %v660_v0  ;;  %v554_v35 = vld [vmem:[%s889_s5] ss:$0 sm:$0xff] }
   0x9   :  { %v564_v44 = vld [vmem:[%s891_s11] ss:$0 sm:$0xff] }
   0xa   :  { %v561_v50 = vld [vmem:[%s893_s8] ss:$0 sm:$0xff] }
   0xb   :  { %592 = vmatpush3.bf16.msra.mxu0 %v647_v3  ;;  %v562_v62 = vld [vmem:[#allocation2] ss:$0 sm:$0xff] }
   0xc   :  { %593 = vmatprep.subr.bf16.mxu0 %v660_v0 }
   0xf   :  { %594 = vmatpush3.bf16.msra.mxu0 %v648_v4  ;;  %v557_v4 = vld [vmem:[%s896_s7] ss:$0 sm:$0xff] }
  0x10   :  { %595 = vmatprep.subr.bf16.mxu0 %v660_v0 }
  0x13   :  { %596 = vmatpush3.bf16.msra.mxu0 %v649_v5 }
  0x14   :  { %597 = vmatprep.subr.bf16.mxu0 %v660_v0 }
  0x17   :  { %598 = vmatpush3.bf16.msra.mxu0 %v650_v6  ;;  %v563_v6 = vld [vmem:[%s897_s10] ss:$0 sm:$0xff] }
  0x18   :  { %599 = vmatprep.subr.bf16.mxu0 %v660_v0 }
  0x1b   :  { %600 = vmatpush3.bf16.msra.mxu0 %v651_v7 }
  0x1c   :  { %629 = vmatprep.subr.bf16.mxu0 %v660_v0 }
  0x1e   :  { %602 = vmatmul.mubr.msk.bf16.vlgmr.msra.gmra.mrb[0].mxu0 %vm113_vm1, %v652_v8 }
  0x1f   :  { %631 = vmatprep.mubr.msk.bf16.mxu0 %vm661_vm0, %v660_v0 }
  0xf1   :  { %v151_v9 = vpop.f32.mrb[0].mxu0 }
  0xf2   :  { %v603_v10 = vpop.f32.mrb[1].mxu0 }
  0xf3   :  { %v154_v11 = vpop.f32.mrb[2].mxu0 }
  0xf4   :  { %v158_v12 = vpack.c.bf16 %v154_v11, %v151_v9  ;;  %v604_v13 = vpop.f32.mrb[3].mxu0 }
  0xf6   :  { %606 = vmatpush3.bf16.msra.mxu1 %v158_v12 }
  0xf7   :  { %611 = vmatprep.subr.bf16.mxu1 %v660_v0 }
  0xf9   :  { %608 = vmatmul.mubr.msk.bf16.vlgmr.msra.gmra.mrb[0].mxu1 %vm171_vm2, %v784_v14 }
  0xfa   :  { %612 = vmatpush3.bf16.msra.mxu1 %v654_v15  ;;  %619 = vmatprep.mubr.msk.bf16.mxu1 %vm661_vm0, %v660_v0 }
  0xfb   :  { %613 = vmatprep.subr.bf16.mxu1 %v660_v0 }
  0xfe   :  { %614 = vmatpush3.bf16.msra.mxu1 %v655_v16 }
  0xff   :  { %615 = vmatprep.subr.bf16.mxu1 %v660_v0 }
 0x102   :  { %616 = vmatpush3.bf16.msra.mxu1 %v656_v17 }
 0x103   :  { %617 = vmatprep.subr.bf16.mxu1 %v660_v0 }
 0x106   :  { %618 = vmatpush3.bf16.msra.mxu1 %v657_v18 }
 0x107   :  { %623 = vmatprep.subr.bf16.mxu1 %v660_v0 }
 0x1cc   :  { %v209_v20 = vpop.f32.mrb[0].mxu1 }
 0x1cd   :  { %v210_v21 = vadd.f32 %v546_v19, %v209_v20  ;;  %v609_v22 = vpop.f32.mrb[1].mxu1 }
 0x1ce   :  { %v212_v23 = vpop.f32.mrb[2].mxu1 }
 0x1cf   :  { %v213_v24 = vadd.f32 %v546_v19, %v212_v23  ;;  %v610_v25 = vpop.f32.mrb[3].mxu1  ;;  %v216_v26 = vmax.f32 %v210_v21, 0.0 }
 0x1d1   :  { %v217_v27 = vmax.f32 %v213_v24, 0.0 }
 0x1d3   :  { %v218_v28 = vpack.c.bf16 %v217_v27, %v216_v26 }
 0x1d5   :  { %620 = vmatmul.mubr.msk.bf16.vlgmr.msra.gmra.mrb[4].mxu1 %vm251_vm3, %v218_v28 }
 0x1d6   :  { %625 = vmatprep.mubr.msk.bf16.mxu1 %vm661_vm0, %v660_v0 }
 0x2a8   :  { %v289_v29 = vpop.f32.mrb[4].mxu1 }
 0x2a9   :  { %v621_v30 = vpop.f32.mrb[5].mxu1 }
 0x2aa   :  { %v292_v31 = vpop.f32.mrb[6].mxu1 }
 0x2ab   :  { %v296_v32 = vpack.c.bf16 %v292_v31, %v289_v29  ;;  %v622_v33 = vpop.f32.mrb[7].mxu1 }
 0x2ad   :  { %624 = vmatpush3.bf16.msra.mxu1 %v296_v32 }
 0x2ae   :  { %635 = vmatprep.subr.bf16.mxu1 %v660_v0 }
 0x2b0   :  { %626 = vmatmul.mubr.msk.bf16.vlgmr.msra.gmra.mrb[8].mxu1 %vm171_vm2, %v784_v14 }
 0x2b1   :  { %639 = vmatprep.mubr.msk.bf16.mxu1 %vm661_vm0, %v660_v0  ;;  %636 = vmatpush3.bf16.msra.mxu1 %v658_v34 }
 0x2b2   :  { %637 = vmatprep.subr.bf16.mxu1 %v660_v0 }
 0x2b5   :  { %638 = vmatpush3.bf16.msra.mxu1 %v415_v48 }
 0x383   :  { %v338_v36 = vpop.f32.mrb[8].mxu1 }
 0x384   :  { %v339_v37 = vadd.f32 %v554_v35, %v338_v36  ;;  %v627_v38 = vpop.f32.mrb[9].mxu1 }
 0x385   :  { %v341_v39 = vpop.f32.mrb[10].mxu1 }
 0x386   :  { %v345_v40 = vmax.f32 %v339_v37, 0.0  ;;  %v342_v41 = vadd.f32 %v554_v35, %v341_v39  ;;  %v628_v42 = vpop.f32.mrb[11].mxu1 }
 0x388   :  { %512 = vst.msk [vmem:[%s890_s12] sm:$0xff] %vm409_vm4, %v345_v40  ;;  %v346_v43 = vmax.f32 %v342_v41, 0.0  ;;  %v504_v60 = vmul.f32 %v564_v44, %v345_v40 }
 0x38a   :  { %v347_v45 = vpack.c.bf16 %v346_v43, %v345_v40  ;;  %513 = vst.msk [vmem:[%s890_s12 + $0x8] sm:$0xff] %vm409_vm4, %v346_v43  ;;  %v505_v46 = vmul.f32 %v564_v44, %v346_v43  ;;  %v506_v61 = vsel %vm409_vm4, %v504_v60, 0.0 }
 0x38c   :  { %630 = vmatpush3.bf16.msra.mxu0 %v347_v45  ;;  %v509_v16 = vsel %vm409_vm4, %v505_v46, 0.0 }
 0x38f   :  { %632 = vmatmul.mubr.msk.bf16.vlgmr.msra.gmra.mrb[4].mxu0 %vm171_vm2, %v784_v14 }
 0x462   :  { %v382_v51 = vpop.f32.mrb[4].mxu0 }
 0x463   :  { %v633_v52 = vpop.f32.mrb[5].mxu0  ;;  %v465_v53 = vmul.f32 %v561_v50, %v382_v51 }
 0x464   :  { %v385_v54 = vpop.f32.mrb[6].mxu0 }
 0x465   :  { %v389_v55 = vpack.c.bf16 %v385_v54, %v382_v51  ;;  %v466_v56 = vmul.f32 %v561_v50, %v385_v54  ;;  %v467_v57 = vsel %vm409_vm4, %v465_v53, 0.0  ;;  %v634_v58 = vpop.f32.mrb[7].mxu0 }
 0x466   :  { %468 = vadd.xlane.f32.xlu0 %v467_v57 }
 0x467   :  { %640 = vmatmul.mubr.msk.bf16.vlgmr.msra.gmra.mrb[12].mxu1 %vm409_vm4, %v389_v55  ;;  %v470_v59 = vsel %vm409_vm4, %v466_v56, 0.0 }
 0x46a   :  { %471 = vadd.xlane.f32.xlu0 %v470_v59 }
 0x46e   :  { %507 = vadd.xlane.f32.xlu0 %v506_v61 }
 0x4f3   :  { %v469_v63 = vpop.xlane.xlu0 %468 }
 0x4f4   :  { %v480_v0 = vadd.f32 %v562_v62, %v469_v63 }
 0x4f6   :  { %515 = vst.msk [vmem:[%s894_s13] sm:$0xff] %vm514_vm6, %v480_v0 }
 0x4f7   :  { %v472_v1 = vpop.xlane.xlu0 %471 }
 0x4f8   :  { %v481_v2 = vadd.f32 %v562_v62, %v472_v1 }
 0x4fa   :  { %516 = vst.msk [vmem:[%s894_s13 + $0x8] sm:$0xff] %vm514_vm6, %v481_v2 }
 0x4fb   :  { %v508_v3 = vpop.xlane.xlu0 %507 }
 0x4fc   :  { %519 = vst.msk [vmem:[%s895_s15] sm:$0xff] %vm514_vm6, %v508_v3 }
 0x53a   :  { %v451_v5 = vpop.f32.mrb[12].mxu1 }
 0x53b   :  { %v452_v7 = vadd.f32 %v557_v4, %v451_v5  ;;  %v641_v8 = vpop.f32.mrb[13].mxu1 }
 0x53c   :  { %v454_v9 = vpop.f32.mrb[14].mxu1 }
 0x53d   :  { %v455_v10 = vadd.f32 %v557_v4, %v454_v9  ;;  %v642_v11 = vpop.f32.mrb[15].mxu1  ;;  %v489_v12 = vmul.f32 %v563_v6, %v452_v7 }
 0x53f   :  { %v491_v13 = vsel %vm409_vm4, %v489_v12, 0.0  ;;  %v490_v14 = vmul.f32 %v563_v6, %v455_v10 }
 0x540   :  { %492 = vadd.xlane.f32.xlu1 %v491_v13 }
 0x541   :  { %v494_v15 = vsel %vm409_vm4, %v490_v14, 0.0 }
 0x544   :  { %495 = vadd.xlane.f32.xlu1 %v494_v15 }
 0x548   :  { %510 = vadd.xlane.f32.xlu1 %v509_v16 }
 0x5cd   :  { %v493_v17 = vpop.xlane.xlu1 %492 }
 0x5ce   :  { %517 = vst.msk [vmem:[%s898_s14] sm:$0xff] %vm514_vm6, %v493_v17 }
 0x5d1   :  { %v496_v18 = vpop.xlane.xlu1 %495 }
 0x5d2   :  { %518 = vst.msk [vmem:[%s898_s14 + $0x8] sm:$0xff] %vm514_vm6, %v496_v18 }
 0x5d5   :  { %v511_v19 = vpop.xlane.xlu1 %510 }
 0x5d6   :  { %520 = vst.msk [vmem:[%s895_s15 + $0x8] sm:$0xff] %vm514_vm6, %v511_v19 }

// kernel: local_gnn_forward.3
= control target key start
LH: loop header
LB: loop body
LE: loop exit
PB: predicated region body
PF: predicated region fallthrough
CT: control target
= control target key end

     0   :  { %v244_v0 = vmov 0   ;;  %v245_v4 = vmov 0.0   ;;  %vm83_vm0 = vcmask 1041408   ;;  %vm246_vm1 = vmmov 0   ;;  %s315_s2 = inlined_call_operand.vmem [shape: f32[15,1], index: 2, kind: input, shape index: {}]   ;;  %s316_s3 = inlined_call_operand.vmem [shape: bf16[20,20], index: 3, kind: input, shape index: {}]   ;;  %s317_s0 = inlined_call_operand.vmem [shape: f32[15,15], index: 0, kind: input, shape index: {}]   ;;  %s318_s1 = inlined_call_operand.vmem [shape: f32[15,20], index: 1, kind: input, shape index: {}]   ;;  %s319_s4 = inlined_call_operand.vmem [shape: f32[1,20], index: 4, kind: input, shape index: {}]   ;;  %s320_s5 = inlined_call_operand.vmem [shape: f32[15,20], index: 5, kind: output, shape index: {}]  }
   0x1   :  { %233 = vset.pattern.permute.xlu0 %v244_v0  ;;  %v50_v1 = vld [vmem:[%s315_s2] sm:$0xff]  ;;  %v51_v2 = vld [vmem:[%s315_s2 + $0x8] sm:$0x7f]  ;;  %215 = vmatprep.subr.bf16.mxu0 %v245_v4  ;;  %v23_v9 = vlaneseq  ;;  %vm34_vm3 = vcmask 121856   ;;  %vm38_vm5 = vcmask 120832   ;;  %vm79_vm6 = vcmask 162816  }
   0x2   :  { %236 = vtanh.f32 %v50_v1  ;;  %v234_v5 = vld [vmem:[%s316_s3] sm:$0xff]   ;;  %223 = vmatprep.subr.bf16.mxu1 %v245_v4  ;;  %v235_v7 = vld [vmem:[%s316_s3 + $0x8] ss:$0 sps:$4 sm:$0x33]   ;;  %219 = vmatprep.mubr.msk.bf16.mxu0 %vm246_vm1, %v245_v4  ;;  %vm135_vm7 = vcmask 1046528   ;;  %vm136_vm10 = vcmask 1047552  }
   0x3   :  { %238 = vtanh.f32 %v51_v2  ;;  %216 = vmatpush3.bf16.msra.mxu0 %v234_v5  ;;  %v85_v8 = vsel %vm83_vm0, %v235_v7, 0  ;;  %225 = vmatprep.mubr.msk.bf16.mxu1 %vm246_vm1, %v245_v4  ;;  %v24_v10 = vshrl.u32 %v23_v9, 7  ;;  %v27_v11 = vand.u32 127, %v23_v9  ;;  %v21_v12 = vld [vmem:[%s317_s0] sm:$0xff]  ;;  %v22_v15 = vld [vmem:[%s317_s0 + $0x8] sm:$0x7f] }
   0x4   :  { %217 = vmatprep.subr.bf16.mxu0 %v245_v4  ;;  %v48_v23 = vld [vmem:[%s318_s1] sm:$0xff]  ;;  %v49_v24 = vld [vmem:[%s318_s1 + $0x8] sm:$0x7f]  ;;  %v247_v35 = vmov 65535   ;;  %vm199_vm11 = vcmask 161792  }
   0x5   :  { %vm28_vm2 = vcmp.eq.s32.totalorder %v24_v10, %v27_v11  ;;  %v25_v13 = vadd.s32 8, %v24_v10  ;;  %v137_v36 = vsel %vm135_vm7, 4294967295, %v247_v35  ;;  %v209_v47 = vld [vmem:[%s319_s4] ss:$0 sm:$0xff] }
   0x6   :  { %v30_v14 = vsel %vm28_vm2, 1.0, %v245_v4  ;;  %v138_v43 = vsel %vm136_vm10, %v137_v36, 0 }
   0x7   :  { %218 = vmatpush3.bf16.msra.mxu0 %v85_v8  ;;  %v32_v16 = vadd.f32 %v30_v14, %v21_v12  ;;  %vm29_vm4 = vcmp.eq.s32.totalorder %v25_v13, %v27_v11 }
   0x8   :  { %v31_v17 = vsel %vm29_vm4, 1.0, %v245_v4 }
   0x9   :  { %v35_v18 = vsel %vm34_vm3, %v32_v16, 0.0  ;;  %v33_v19 = vadd.f32 %v31_v17, %v22_v15 }
   0xa   :  { %36 = vadd.xlane.f32.xlu1 %v35_v18 }
   0xb   :  { %v39_v20 = vsel %vm38_vm5, %v33_v19, 0.0  ;;  %v128_v21 = vpack.c.bf16 %v33_v19, %v32_v16 }
   0xc   :  { %v237_v3 = vpop.eup %236 }
   0xd   :  { %56 = vperm.xlu0 %233, %v237_v3   ;;  %v239_v6 = vpop.eup %238 }
   0xe   :  { %40 = vadd.xlane.f32.xlu1 %v39_v20 }
  0x11   :  { %61 = vperm.xlu0 %233, %v239_v6  }
  0x8c   :  { %v57_v22 = vpop.permute.xlu0 %56 }
  0x8d   :  { %v64_v26 = vmul.f32 %v57_v22, %v48_v23 }
  0x90   :  { %v62_v25 = vpop.permute.xlu0 %61 }
  0x91   :  { %v65_v27 = vmul.f32 %v62_v25, %v49_v24 }
  0x93   :  { %v66_v28 = vpack.c.bf16 %v65_v27, %v64_v26 }
  0x95   :  { %220 = vmatmul.mubr.msk.bf16.vlgmr.msra.gmra.mrb[0].mxu0 %vm79_vm6, %v66_v28 }
  0x97   :  { %v37_v29 = vpop.xlane.xlu1 %36 }
  0x98   :  { %240 = vrsqrt.f32 %v37_v29  ;;  %vm42_vm8 = vcmp.gt.f32.partialorder %v37_v29, 0.0 }
  0x9b   :  { %v41_v30 = vpop.xlane.xlu1 %40 }
  0x9c   :  { %242 = vrsqrt.f32 %v41_v30  ;;  %vm43_vm9 = vcmp.gt.f32.partialorder %v41_v30, 0.0 }
  0xa2   :  { %v241_v31 = vpop.eup %240 }
  0xa3   :  { %v46_v37 = vsel %vm42_vm8, %v241_v31, 0.0 }
  0xa6   :  { %v243_v32 = vpop.eup %242 }
  0xa7   :  { %v47_v38 = vsel %vm43_vm9, %v243_v32, 0.0 }
 0x168   :  { %v121_v33 = vpop.f32.mrb[0].mxu0 }
 0x169   :  { %v221_v34 = vpop.f32.mrb[1].mxu0  ;;  %v129_v40 = vmul.f32 %v121_v33, %v46_v37 }
 0x16a   :  { %v124_v39 = vpop.f32.mrb[2].mxu0 }
 0x16b   :  { %v130_v41 = vmul.f32 %v124_v39, %v47_v38  ;;  %v222_v42 = vpop.f32.mrb[3].mxu0 }
 0x16d   :  { %v131_v44 = vpack.c.bf16 %v130_v41, %v129_v40 }
 0x16f   :  { %v140_v45 = vand.u32 %v138_v43, %v131_v44 }
 0x171   :  { %224 = vmatpush3.bf16.msra.mxu1 %v140_v45 }
 0x174   :  { %226 = vmatmul.mubr.msk.bf16.vlgmr.msra.gmra.mrb[0].mxu1 %vm34_vm3, %v128_v21 }
 0x247   :  { %v176_v46 = vpop.f32.mrb[0].mxu1 }
 0x248   :  { %v183_v48 = vmul.f32 %v176_v46, %v46_v37  ;;  %v227_v49 = vpop.f32.mrb[1].mxu1 }
 0x249   :  { %v179_v50 = vpop.f32.mrb[2].mxu1 }
 0x24a   :  { %v192_v51 = vadd.f32 %v209_v47, %v183_v48  ;;  %v184_v52 = vmul.f32 %v179_v50, %v47_v38  ;;  %v228_v53 = vpop.f32.mrb[3].mxu1 }
 0x24c   :  { %v194_v54 = vmax.f32 %v192_v51, 0.0  ;;  %v193_v55 = vadd.f32 %v209_v47, %v184_v52 }
 0x24e   :  { %v196_v56 = vadd.f32 %v194_v54, %v64_v26  ;;  %v195_v57 = vmax.f32 %v193_v55, 0.0 }
 0x250   :  { %198 = vst.msk [vmem:[%s320_s5] sm:$0xff] %vm79_vm6, %v196_v56  ;;  %v197_v58 = vadd.f32 %v195_v57, %v65_v27 }
 0x252   :  { %200 = vst.msk [vmem:[%s320_s5 + $0x8] sm:$0x7f] %vm199_vm11, %v197_v58 }

</bundles_post_ra>
